<compile_context>
chip_gen: v7x
topology: tpu7x:2x2x1
jax: 0.10.0
libtpu: 0.0.40
codegen_flags: <defaults>
</compile_context>

<pallas_src>
import functools

import jax
import jax.numpy as jnp
from jax.experimental import pallas as pl
from jax.experimental.pallas import tpu as pltpu


def _round_up(x, m):
    return ((x + m - 1) // m) * m


# ----------------------------- fused Pallas kernel ---------------------------


def _fused_forward_kernel(p_ref, cw_ref, wb_ref, out_ref,
                          *, bn, hw, chid, qd, dqd, offs):
    """One grid step = one batch block.

    p_ref   : (bn*HW, 128) bf16  im2col patches for this batch block (KKC padded to 128)
    cw_ref  : (128, Chid)  bf16  conv weight (contraction dim zero-padded to 128)
    wb_ref  : (R, 128)     f32   packed head weights + biases
                                 [w1 | wfc | wd1 | wd2 | wd3 | 8 bias rows]
    out_ref : (bn, 128)    f32   packed lane-dense output [fea | q | dq | 0-pad]
    """
    o_w1, o_wfc, o_wd1, o_wd2, o_wd3, o_b = offs

    b_all = wb_ref[o_b:o_b + 8, :]                         # (8, 128) bias rows
    conv_b = b_all[0:1, :chid]

    # conv-as-matmul (bf16 operands, f32 accumulate) + bias + ReLU
    h = jnp.dot(p_ref[...], cw_ref[...], preferred_element_type=jnp.float32)
    h = jnp.maximum(h + conv_b, 0.0)                       # (bn*HW, Chid)

    # global average pool: f32 reshape-sum (XLU reduction; no pool matrix / DMA)
    fea = jnp.sum(h.reshape(bn, hw, chid), axis=1) * (1.0 / float(hw))  # (bn, Chid)

    # head weights sliced from the packed slab (static, 8-row-aligned offsets)
    w1 = wb_ref[o_w1:o_w1 + chid, :chid]
    wfc = wb_ref[o_wfc:o_wfc + chid, :qd]
    wd1 = wb_ref[o_wd1:o_wd1 + qd, :64]
    wd2 = wb_ref[o_wd2:o_wd2 + 64, :32]
    wd3 = wb_ref[o_wd3:o_wd3 + 32, :dqd]
    b1 = b_all[1:2, :chid]
    bfc = b_all[2:3, :qd]
    bd1 = b_all[3:4, :64]
    bd2 = b_all[4:5, :32]
    bd3 = b_all[5:6, :dqd]

    # self.mlp : Linear -> ReLU -> fc
    m = jnp.maximum(jnp.dot(fea, w1, preferred_element_type=jnp.float32) + b1, 0.0)
    q = jnp.dot(m, wfc, preferred_element_type=jnp.float32) + bfc

    # self.drop_mlp : Linear -> LeakyReLU(0.1) -> Linear -> LeakyReLU(0.1) -> Linear
    lrelu = lambda v: jnp.where(v > 0.0, v, 0.1 * v)
    d = lrelu(jnp.dot(q, wd1, preferred_element_type=jnp.float32) + bd1)
    d = lrelu(jnp.dot(d, wd2, preferred_element_type=jnp.float32) + bd2)
    dq = jnp.dot(d, wd3, preferred_element_type=jnp.float32) + bd3

    # single full-width lane-dense store (no masked partial writes)
    pad = jnp.zeros((bn, 128 - (chid + qd + dqd)), jnp.float32)
    out_ref[...] = jnp.concatenate([fea, q, dq, pad], axis=-1)


# ------------------------------- JAX wrapper ----------------------------------


def _im2col(x_nhwc, k=3):
    """Glue: NHWC -> (N, H*W, K*K*Cin) patch matrices (pad=1, stride=1)."""
    n, h, w, c = x_nhwc.shape
    xp = jnp.pad(x_nhwc, ((0, 0), (1, 1), (1, 1), (0, 0)))
    cols = []
    for kh in range(k):
        for kw in range(k):
            cols.append(xp[:, kh:kh + h, kw:kw + w, :])
    patches = jnp.stack(cols, axis=3)                      # (N, H, W, K*K, Cin)
    return patches.reshape(n, h * w, k * k * c)


def _pack_constants(params, lane=128):
    """Pack head weights + all biases into one (R, 128) f32 slab (8-row aligned)."""
    mats = [params["w1"], params["wfc"], params["wd1"], params["wd2"], params["wd3"]]
    offs, rows = [], 0
    for m in mats:
        assert m.shape[1] <= lane
        offs.append(rows)
        rows += _round_up(m.shape[0], 8)
    o_b = rows
    rows += 8                                              # 8 bias rows
    slab = jnp.zeros((_round_up(rows, 8), lane), jnp.float32)
    for o, m in zip(offs, mats):
        slab = slab.at[o:o + m.shape[0], :m.shape[1]].set(m.astype(jnp.float32))
    biases = [params["conv_b"], params["b1"], params["bfc"],
              params["bd1"], params["bd2"], params["bd3"]]
    for i, b in enumerate(biases):
        v = b.reshape(-1).astype(jnp.float32)
        slab = slab.at[o_b + i, :v.shape[0]].set(v)
    return slab, tuple(offs) + (o_b,)


@jax.jit
def adjusted_standard_model_forward(x_nchw, params):
    """Returns (fea, {'q': q, 'dropdown_q': dq}) matching the PyTorch forward."""
    n, cin, h, w = x_nchw.shape
    chid = params["conv_w"].shape[-1]
    qd = params["wfc"].shape[-1]
    dqd = params["wd3"].shape[-1]
    hw = h * w

    # glue: NCHW -> NHWC -> im2col patches flattened over batch, KKC padded to 128,
    # cast to bf16 (f32 accumulate in-kernel).
    # TODO(synk): for large backbones generate the 3x3 patches inside the kernel
    # (9 shifted-slice dot-accumulations from a (bn, H+2, W+2, Cin) VMEM tile) and
    # tile HW with an f32 accumulator so the block fits v7x's 64 MiB VMEM; at
    # 16x16x4 the im2col slab is noise.
    x_nhwc = jnp.transpose(x_nchw, (0, 2, 3, 1))
    patches = _im2col(x_nhwc, k=3).reshape(n * hw, -1)
    kkc = patches.shape[-1]
    assert kkc <= 128, "conv contraction dim must fit one 128-lane pass"
    patches_p = jnp.pad(patches, ((0, 0), (0, 128 - kkc))).astype(jnp.bfloat16)
    conv_w_p = jnp.pad(params["conv_w"],
                       ((0, 128 - kkc), (0, 0))).astype(jnp.bfloat16)

    # Grid: single step unless a 2-way batch split is actually worth it
    # (per-block conv rows >= 1024 so a grid step is amortized, and bn % 8 == 0 so
    # the (bn, 128) out / (bn, hw, chid) GAP blocks satisfy (8,128) tiling).
    # On 1-TC v5e/v6e the split is pure overhead anyway; this also covers them at
    # small sizes (num_blocks == 1 here for the N=2 demo).
    if n % 2 == 0 and (n // 2) % 8 == 0 and (n // 2) * hw >= 1024:
        bn = n // 2
    else:
        bn = n
    num_blocks = n // bn

    # head weights + biases in one resident slab -> 1 DMA
    wb_slab, offs = _pack_constants(params)

    assert chid + qd + dqd <= 128
    out_cols = 128                                         # lane-dense packed output

    kernel = functools.partial(_fused_forward_kernel,
                               bn=bn, hw=hw, chid=chid, qd=qd, dqd=dqd, offs=offs)

    flops = (2 * n * hw * 128 * chid                       # conv matmul (padded K)
             + n * hw * chid                               # GAP reduction
             + 2 * n * (chid * chid + chid * qd + qd * 64 + 64 * 32 + 32 * dqd))
    bytes_accessed = (patches_p.size * 2 + conv_w_p.size * 2
                      + (wb_slab.size + n * out_cols) * 4)

    packed = pl.pallas_call(
        kernel,
        out_shape=jax.ShapeDtypeStruct((n, out_cols), jnp.float32),
        grid_spec=pltpu.PrefetchScalarGridSpec(
            num_scalar_prefetch=0,
            grid=(num_blocks,),
            in_specs=[
                pl.BlockSpec((bn * hw, 128), lambda i: (i, 0)),
                pl.BlockSpec((128, chid), lambda i: (0, 0)),
                pl.BlockSpec(wb_slab.shape, lambda i: (0, 0)),
            ],
            out_specs=pl.BlockSpec((bn, out_cols), lambda i: (i, 0)),
        ),
        compiler_params=pltpu.CompilerParams(
            dimension_semantics=("parallel",)),
        cost_estimate=pl.CostEstimate(
            flops=flops, transcendentals=0, bytes_accessed=bytes_accessed),
    )(patches_p, conv_w_p, wb_slab)

    fea = packed[:, :chid]
    q = packed[:, chid:chid + qd]
    dq = packed[:, chid + qd:chid + qd + dqd]
    return fea, {"q": q, "dropdown_q": dq}


# ------------------------ pure-JAX reference (check) --------------------------


def _reference(x_nchw, params):
    n, cin, h, w = x_nchw.shape
    hw = h * w
    x_nhwc = jnp.transpose(x_nchw, (0, 2, 3, 1))
    # same bf16 quantization of the conv operands as the kernel, f32 accumulate
    patches = _im2col(x_nhwc, k=3).reshape(n * hw, -1).astype(jnp.bfloat16)
    cw = params["conv_w"].astype(jnp.bfloat16)
    hm = jnp.dot(patches, cw, preferred_element_type=jnp.float32) + params["conv_b"]
    hm = jnp.maximum(hm, 0.0)
    fea = jnp.mean(hm.reshape(n, hw, -1), axis=1)
    m = jnp.maximum(fea @ params["w1"] + params["b1"], 0.0)
    q = m @ params["wfc"] + params["bfc"]
    lrelu = lambda v: jnp.where(v > 0.0, v, 0.1 * v)
    d = lrelu(q @ params["wd1"] + params["bd1"])
    d = lrelu(d @ params["wd2"] + params["bd2"])
    dq = d @ params["wd3"] + params["bd3"]
    return fea, q, dq


# ---------------------------------- main ---------------------------------------


def _make_params(key, cin=4, chid=32, q_dim=8, dq_dim=4, k=3):
    ks = jax.random.split(key, 12)

    def w(k_, shape, fan_in):
        return (jax.random.normal(k_, shape, jnp.float32) /
                jnp.sqrt(fan_in)).astype(jnp.float32)

    return {
        # conv weight laid out as (K*K*Cin, Chid) to match im2col ordering (kh, kw, cin)
        "conv_w": w(ks[0], (k * k * cin, chid), k * k * cin),
        "conv_b": w(ks[1], (1, chid), chid),
        "w1": w(ks[2], (chid, chid), chid),
        "b1": w(ks[3], (1, chid), chid),
        "wfc": w(ks[4], (chid, q_dim), chid),
        "bfc": w(ks[5], (1, q_dim), q_dim),
        "wd1": w(ks[6], (q_dim, 64), q_dim),
        "bd1": w(ks[7], (1, 64), 64),
        "wd2": w(ks[8], (64, 32), 64),
        "bd2": w(ks[9], (1, 32), 32),
        "wd3": w(ks[10], (32, dq_dim), 32),
        "bd3": w(ks[11], (1, dq_dim), dq_dim),
    }


if __name__ == "__main__":
    key = jax.random.PRNGKey(0)
    kx, kp = jax.random.split(key)

    N, CIN, H, W = 2, 4, 16, 16
    x = jax.random.normal(kx, (N, CIN, H, W), jnp.float32)   # NCHW like PyTorch
    params = _make_params(kp, cin=CIN, chid=32, q_dim=8, dq_dim=4)

    fea, out_dict = adjusted_standard_model_forward(x, params)
    jax.block_until_ready((fea, out_dict["q"], out_dict["dropdown_q"]))

    fea_r, q_r, dq_r = _reference(x, params)
    assert jnp.allclose(fea, fea_r, atol=1e-3, rtol=1e-3)
    assert jnp.allclose(out_dict["q"], q_r, atol=1e-3, rtol=1e-3)
    assert jnp.allclose(out_dict["dropdown_q"], dq_r, atol=1e-3, rtol=1e-3)

    print("KERNEL_OK")
</pallas_src>

<mosaic_0001>
module attributes {stable_mosaic.version = 11 : i64} {
  func.func @_fused_forward_kernel(%arg0: i32, %arg1: memref<512x128xbf16, #tpu.memory_space<vmem>>, %arg2: memref<128x32xbf16, #tpu.memory_space<vmem>>, %arg3: memref<176x128xf32, #tpu.memory_space<vmem>>, %arg4: memref<2x128xf32, #tpu.memory_space<vmem>>) attributes {dimension_semantics = [#tpu.dimension_semantics<parallel>], iteration_bounds = array<i64: 1>, scalar_prefetch = 0 : i64, scratch_operands = 0 : i64, tpu.core_type = #tpu.core_type<tc>, window_params = [{transform_indices = @transform_0, window_bounds = array<i64: 512, 128>}, {pipeline_mode = #tpu.pipeline_mode<synchronous>, transform_indices = @transform_1, window_bounds = array<i64: 128, 32>}, {pipeline_mode = #tpu.pipeline_mode<synchronous>, transform_indices = @transform_2, window_bounds = array<i64: 176, 128>}, {transform_indices = @transform_3, window_bounds = array<i64: 2, 128>}]} {
    %c168 = arith.constant 168 : index
    %c0 = arith.constant 0 : index
    %0 = vector.load %arg3[%c168, %c0] : memref<176x128xf32, #tpu.memory_space<vmem>>, vector<8x128xf32>
    %1 = vector.extract_strided_slice %0 {offsets = [0, 0], sizes = [1, 32], strides = [1, 1]} : vector<8x128xf32> to vector<1x32xf32>
    %c0_0 = arith.constant 0 : index
    %c0_1 = arith.constant 0 : index
    %2 = vector.load %arg1[%c0_0, %c0_1] : memref<512x128xbf16, #tpu.memory_space<vmem>>, vector<512x128xbf16>
    %c0_2 = arith.constant 0 : index
    %c0_3 = arith.constant 0 : index
    %3 = vector.load %arg2[%c0_2, %c0_3] : memref<128x32xbf16, #tpu.memory_space<vmem>>, vector<128x32xbf16>
    %cst = arith.constant dense<0.000000e+00> : vector<512x32xf32>
    %4 = tpu.matmul %2, %3, %cst {dimension_numbers = #tpu.dot_dimension_numbers<[1], [0], [0], [1], [0, 0, 1, 1], [], []>} : vector<512x128xbf16>, vector<128x32xbf16>, vector<512x32xf32> -> vector<512x32xf32>
    %5 = vector.broadcast %1 : vector<1x32xf32> to vector<512x32xf32>
    %6 = arith.addf %4, %5 : vector<512x32xf32>
    %cst_4 = arith.constant 0.000000e+00 : f32
    %7 = vector.broadcast %cst_4 : f32 to vector<512x32xf32>
    %8 = arith.maximumf %6, %7 : vector<512x32xf32>
    %9 = vector.shape_cast %8 : vector<512x32xf32> to vector<2x256x32xf32>
    %cst_5 = arith.constant dense<0.000000e+00> : vector<2x32xf32>
    %10 = vector.multi_reduction <add>, %9, %cst_5 [1] : vector<2x256x32xf32> to vector<2x32xf32>
    %cst_6 = arith.constant 3.906250e-03 : f32
    %11 = vector.broadcast %cst_6 : f32 to vector<2x32xf32>
    %12 = arith.mulf %10, %11 : vector<2x32xf32>
    %c0_7 = arith.constant 0 : index
    %c0_8 = arith.constant 0 : index
    %13 = vector.load %arg3[%c0_7, %c0_8] : memref<176x128xf32, #tpu.memory_space<vmem>>, vector<32x32xf32>
    %c32 = arith.constant 32 : index
    %c0_9 = arith.constant 0 : index
    %14 = vector.load %arg3[%c32, %c0_9] : memref<176x128xf32, #tpu.memory_space<vmem>>, vector<32x8xf32>
    %c64 = arith.constant 64 : index
    %c0_10 = arith.constant 0 : index
    %15 = vector.load %arg3[%c64, %c0_10] : memref<176x128xf32, #tpu.memory_space<vmem>>, vector<8x64xf32>
    %c72 = arith.constant 72 : index
    %c0_11 = arith.constant 0 : index
    %16 = vector.load %arg3[%c72, %c0_11] : memref<176x128xf32, #tpu.memory_space<vmem>>, vector<64x32xf32>
    %c136 = arith.constant 136 : index
    %c0_12 = arith.constant 0 : index
    %17 = vector.load %arg3[%c136, %c0_12] : memref<176x128xf32, #tpu.memory_space<vmem>>, vector<32x4xf32>
    %18 = vector.extract_strided_slice %0 {offsets = [1, 0], sizes = [1, 32], strides = [1, 1]} : vector<8x128xf32> to vector<1x32xf32>
    %19 = vector.extract_strided_slice %0 {offsets = [2, 0], sizes = [1, 8], strides = [1, 1]} : vector<8x128xf32> to vector<1x8xf32>
    %20 = vector.extract_strided_slice %0 {offsets = [3, 0], sizes = [1, 64], strides = [1, 1]} : vector<8x128xf32> to vector<1x64xf32>
    %21 = vector.extract_strided_slice %0 {offsets = [4, 0], sizes = [1, 32], strides = [1, 1]} : vector<8x128xf32> to vector<1x32xf32>
    %22 = vector.extract_strided_slice %0 {offsets = [5, 0], sizes = [1, 4], strides = [1, 1]} : vector<8x128xf32> to vector<1x4xf32>
    %cst_13 = arith.constant dense<0.000000e+00> : vector<2x32xf32>
    %23 = tpu.matmul %12, %13, %cst_13 {dimension_numbers = #tpu.dot_dimension_numbers<[1], [0], [0], [1], [0, 0, 1, 1], [], []>} : vector<2x32xf32>, vector<32x32xf32>, vector<2x32xf32> -> vector<2x32xf32>
    %24 = vector.broadcast %18 : vector<1x32xf32> to vector<2x32xf32>
    %25 = arith.addf %23, %24 : vector<2x32xf32>
    %cst_14 = arith.constant 0.000000e+00 : f32
    %26 = vector.broadcast %cst_14 : f32 to vector<2x32xf32>
    %27 = arith.maximumf %25, %26 : vector<2x32xf32>
    %cst_15 = arith.constant dense<0.000000e+00> : vector<2x8xf32>
    %28 = tpu.matmul %27, %14, %cst_15 {dimension_numbers = #tpu.dot_dimension_numbers<[1], [0], [0], [1], [0, 0, 1, 1], [], []>} : vector<2x32xf32>, vector<32x8xf32>, vector<2x8xf32> -> vector<2x8xf32>
    %29 = vector.broadcast %19 : vector<1x8xf32> to vector<2x8xf32>
    %30 = arith.addf %28, %29 : vector<2x8xf32>
    %cst_16 = arith.constant dense<0.000000e+00> : vector<2x64xf32>
    %31 = tpu.matmul %30, %15, %cst_16 {dimension_numbers = #tpu.dot_dimension_numbers<[1], [0], [0], [1], [0, 0, 1, 1], [], []>} : vector<2x8xf32>, vector<8x64xf32>, vector<2x64xf32> -> vector<2x64xf32>
    %32 = vector.broadcast %20 : vector<1x64xf32> to vector<2x64xf32>
    %33 = arith.addf %31, %32 : vector<2x64xf32>
    %cst_17 = arith.constant 0.000000e+00 : f32
    %34 = vector.broadcast %cst_17 : f32 to vector<2x64xf32>
    %35 = arith.cmpf ogt, %33, %34 : vector<2x64xf32>
    %cst_18 = arith.constant 1.000000e-01 : f32
    %36 = vector.broadcast %cst_18 : f32 to vector<2x64xf32>
    %37 = arith.mulf %36, %33 : vector<2x64xf32>
    %38 = arith.select %35, %33, %37 : vector<2x64xi1>, vector<2x64xf32>
    %cst_19 = arith.constant dense<0.000000e+00> : vector<2x32xf32>
    %39 = tpu.matmul %38, %16, %cst_19 {dimension_numbers = #tpu.dot_dimension_numbers<[1], [0], [0], [1], [0, 0, 1, 1], [], []>} : vector<2x64xf32>, vector<64x32xf32>, vector<2x32xf32> -> vector<2x32xf32>
    %40 = vector.broadcast %21 : vector<1x32xf32> to vector<2x32xf32>
    %41 = arith.addf %39, %40 : vector<2x32xf32>
    %cst_20 = arith.constant 0.000000e+00 : f32
    %42 = vector.broadcast %cst_20 : f32 to vector<2x32xf32>
    %43 = arith.cmpf ogt, %41, %42 : vector<2x32xf32>
    %cst_21 = arith.constant 1.000000e-01 : f32
    %44 = vector.broadcast %cst_21 : f32 to vector<2x32xf32>
    %45 = arith.mulf %44, %41 : vector<2x32xf32>
    %46 = arith.select %43, %41, %45 : vector<2x32xi1>, vector<2x32xf32>
    %cst_22 = arith.constant dense<0.000000e+00> : vector<2x4xf32>
    %47 = tpu.matmul %46, %17, %cst_22 {dimension_numbers = #tpu.dot_dimension_numbers<[1], [0], [0], [1], [0, 0, 1, 1], [], []>} : vector<2x32xf32>, vector<32x4xf32>, vector<2x4xf32> -> vector<2x4xf32>
    %48 = vector.broadcast %22 : vector<1x4xf32> to vector<2x4xf32>
    %49 = arith.addf %47, %48 : vector<2x4xf32>
    %cst_23 = arith.constant 0.000000e+00 : f32
    %50 = vector.broadcast %cst_23 : f32 to vector<2x84xf32>
    %51 = tpu.concatenate %12, %30, %49, %50 in 1 : vector<2x32xf32>, vector<2x8xf32>, vector<2x4xf32>, vector<2x84xf32> -> vector<2x128xf32>
    %c0_24 = arith.constant 0 : index
    %c0_25 = arith.constant 0 : index
    %52 = vector.load %arg4[%c0_24, %c0_25] : memref<2x128xf32, #tpu.memory_space<vmem>>, vector<2x128xf32>
    tpu.vector_store %arg4[%c0_24, %c0_25], %51 {strides = array<i32>} : memref<2x128xf32, #tpu.memory_space<vmem>>, vector<2x128xf32>,
    return
  }
  func.func @transform_0(%arg0: i32) -> (i32, i32) {
    %c0_i32 = arith.constant 0 : i32
    %c0_i32_0 = arith.constant 0 : i32
    return %arg0, %c0_i32 : i32, i32
  }
  func.func @transform_1(%arg0: i32) -> (i32, i32) {
    %c0_i32 = arith.constant 0 : i32
    %c0_i32_0 = arith.constant 0 : i32
    %c0_i32_1 = arith.constant 0 : i32
    return %c0_i32, %c0_i32_0 : i32, i32
  }
  func.func @transform_2(%arg0: i32) -> (i32, i32) {
    %c0_i32 = arith.constant 0 : i32
    %c0_i32_0 = arith.constant 0 : i32
    %c0_i32_1 = arith.constant 0 : i32
    return %c0_i32, %c0_i32_0 : i32, i32
  }
  func.func @transform_3(%arg0: i32) -> (i32, i32) {
    %c0_i32 = arith.constant 0 : i32
    %c0_i32_0 = arith.constant 0 : i32
    return %arg0, %c0_i32 : i32, i32
  }
}

</mosaic_0001>

<bundles_post_ra>
// kernel: adjusted_standard_model_forward.1
= control target key start
LH: loop header
LB: loop body
LE: loop exit
PB: predicated region body
PF: predicated region fallthrough
CT: control target
= control target key end

     0   :  { %v96_v40 = vlaneseq  ;;  %v1609_v41 = vmov 0.0|0.0   ;;  %vm693_vm0 = vcmask 261120   ;;  %vm1610_vm1 = vmmov 0   ;;  %s1612_s8 = smov 32   ;;  %s2062_s1 = inlined_call_operand.vmem [shape: bf16[128,32], index: 1, kind: input, shape index: {}]   ;;  %s2063_s0 = inlined_call_operand.vmem [shape: bf16[512,128], index: 0, kind: input, shape index: {}]   ;;  %s2064_s2 = inlined_call_operand.vmem [shape: f32[176,128], index: 2, kind: input, shape index: {}]   ;;  %s2065_s3 = inlined_call_operand.vmem [shape: f32[2,128], index: 3, kind: output, shape index: {}]  }
   0x1   :  { %v1569_v0 = vld [vmem:[%s2062_s1] sm:$0xff]   ;;  %v1570_v1 = vld [vmem:[%s2062_s1 + $0x8] sm:$0xff]   ;;  %v1571_v2 = vld [vmem:[%s2062_s1 + $0x10] sm:$0xff]   ;;  %vm861_vm2 = vcmask 1041409   ;;  %vm1017_vm3 = vcmask 64512   ;;  %vm1098_vm5 = vcmask 523264  }
   0x2   :  { %1381 = vmatprep.subr.bf16.mxu0 %v1569_v0  ;;  %1548 = vmatprep.subr.bf16.mxu1 %v1569_v0  ;;  %v1572_v3 = vld [vmem:[%s2062_s1 + $0x18] sm:$0xff]   ;;  %v1577_v4 = vld [vmem:[%s2063_s0] sm:$0xff]   ;;  %v1574_v6 = vld [vmem:[%s2062_s1 + $0x28] sm:$0xff]   ;;  %v1755_v42 = vshrl.u32 %v96_v40, 7  ;;  %vm1261_vm7 = vcmask 326656   ;;  %vm1263_vm8 = vcmask 359424  }
   0x3   :  { %1382 = vmatpush3.bf16.msra.mxu0 %v1569_v0  ;;  %1556 = vmatpush3.bf16.msra.mxu1 %v1569_v0  ;;  %v1573_v5 = vld [vmem:[%s2062_s1 + $0x20] sm:$0xff]   ;;  %v1575_v7 = vld [vmem:[%s2062_s1 + $0x30] sm:$0xff]   ;;  %v1576_v8 = vld [vmem:[%s2062_s1 + $0x38] sm:$0xff]  }
   0x4   :  { %1383 = vmatprep.subr.bf16.mxu0 %v1570_v1  ;;  %1549 = vmatprep.subr.bf16.mxu1 %v1570_v1  ;;  %v1578_v9 = vld [vmem:[%s2063_s0 + $0x8] sm:$0xff]   ;;  %v1579_v10 = vld [vmem:[%s2063_s0 + $0x10] sm:$0xff]   ;;  %v1600_v12 = vld [vmem:[%s2063_s0 + $0xb8] sm:$0xff]   ;;  %v98_v46 = vsub.s32 0, %v1755_v42 }
   0x5   :  { %1397 = vmatprep.mubr.bf16.mxu0 %v1577_v4  ;;  %v1599_v11 = vld [vmem:[%s2063_s0 + $0xb0] sm:$0xff]   ;;  %v1601_v13 = vld [vmem:[%s2063_s0 + $0xc0] sm:$0xff]   ;;  %v1580_v14 = vld [vmem:[%s2063_s0 + $0x18] sm:$0xff]  }
   0x6   :  { %1441 = vmatprep.mubr.bf16.mxu1 %v1599_v11  ;;  %v1581_v15 = vld [vmem:[%s2063_s0 + $0x20] sm:$0xff]   ;;  %v1602_v16 = vld [vmem:[%s2063_s0 + $0xc8] sm:$0xff]   ;;  %v1603_v17 = vld [vmem:[%s2063_s0 + $0xd0] sm:$0xff]  }
   0x7   :  { %1384 = vmatpush3.bf16.msra.mxu0 %v1570_v1  ;;  %1557 = vmatpush3.bf16.msra.mxu1 %v1570_v1  ;;  %v1582_v18 = vld [vmem:[%s2063_s0 + $0x28] sm:$0xff]   ;;  %v1604_v19 = vld [vmem:[%s2063_s0 + $0xd8] sm:$0xff]   ;;  %v1583_v20 = vld [vmem:[%s2063_s0 + $0x30] sm:$0xff]  }
   0x8   :  { %1385 = vmatprep.subr.bf16.mxu0 %v1571_v2  ;;  %1550 = vmatprep.subr.bf16.mxu1 %v1571_v2  ;;  %v1605_v21 = vld [vmem:[%s2063_s0 + $0xe0] sm:$0xff]   ;;  %v1584_v22 = vld [vmem:[%s2063_s0 + $0x38] sm:$0xff]   ;;  %v1606_v23 = vld [vmem:[%s2063_s0 + $0xe8] sm:$0xff]  }
   0x9   :  { %v1585_v24 = vld [vmem:[%s2063_s0 + $0x40] sm:$0xff]   ;;  %v1607_v25 = vld [vmem:[%s2063_s0 + $0xf0] sm:$0xff]   ;;  %v1586_v26 = vld [vmem:[%s2063_s0 + $0x48] sm:$0xff]  }
   0xa   :  { %v1608_v27 = vld [vmem:[%s2063_s0 + $0xf8] sm:$0xff]   ;;  %v1587_v28 = vld [vmem:[%s2063_s0 + $0x50] sm:$0xff]   ;;  %v1589_v30 = vld [vmem:[%s2063_s0 + $0x60] sm:$0xff]  }
   0xb   :  { %1386 = vmatpush3.bf16.msra.mxu0 %v1571_v2  ;;  %1558 = vmatpush3.bf16.msra.mxu1 %v1571_v2  ;;  %v1588_v29 = vld [vmem:[%s2063_s0 + $0x58] sm:$0xff]   ;;  %v1590_v31 = vld [vmem:[%s2063_s0 + $0x68] sm:$0xff]   ;;  %v1591_v32 = vld [vmem:[%s2063_s0 + $0x70] sm:$0xff]  }
   0xc   :  { %1387 = vmatprep.subr.bf16.mxu0 %v1572_v3  ;;  %1551 = vmatprep.subr.bf16.mxu1 %v1572_v3  ;;  %v1592_v33 = vld [vmem:[%s2063_s0 + $0x78] sm:$0xff]   ;;  %v1593_v34 = vld [vmem:[%s2063_s0 + $0x80] sm:$0xff]   ;;  %v1594_v35 = vld [vmem:[%s2063_s0 + $0x88] sm:$0xff]  }
   0xd   :  { %v1595_v36 = vld [vmem:[%s2063_s0 + $0x90] sm:$0xff]   ;;  %v1596_v37 = vld [vmem:[%s2063_s0 + $0x98] sm:$0xff]   ;;  %v1597_v38 = vld [vmem:[%s2063_s0 + $0xa0] sm:$0xff]  }
   0xe   :  { %v1598_v39 = vld [vmem:[%s2063_s0 + $0xa8] sm:$0xff]   ;;  %v834_v43 = vld [vmem:[%s2064_s2] sm:$0xff] }
   0xf   :  { %1388 = vmatpush3.bf16.msra.mxu0 %v1572_v3  ;;  %1559 = vmatpush3.bf16.msra.mxu1 %v1572_v3  ;;  %v835_v44 = vld [vmem:[%s2064_s2 + $0x8] sm:$0xff] }
  0x10   :  { %1389 = vmatprep.subr.bf16.mxu0 %v1573_v5  ;;  %1552 = vmatprep.subr.bf16.mxu1 %v1573_v5  ;;  %v1519_v45 = vpack.c.bf16 %v835_v44, %v834_v43  ;;  %v1767_v47 = vld [vmem:[%s2064_s2 + $0xa8] sm:$0xff] }
  0x11   :  { %v1771_v48 = vrot.slane %v1767_v47, %v98_v46 }
  0x13   :  { %1390 = vmatpush3.bf16.msra.mxu0 %v1573_v5  ;;  %1560 = vmatpush3.bf16.msra.mxu1 %v1573_v5 }
  0x14   :  { %1391 = vmatprep.subr.bf16.mxu0 %v1574_v6  ;;  %1553 = vmatprep.subr.bf16.mxu1 %v1574_v6 }
  0x17   :  { %1392 = vmatpush3.bf16.msra.mxu0 %v1574_v6  ;;  %1561 = vmatpush3.bf16.msra.mxu1 %v1574_v6 }
  0x18   :  { %1393 = vmatprep.subr.bf16.mxu0 %v1575_v7  ;;  %1554 = vmatprep.subr.bf16.mxu1 %v1575_v7 }
  0x1b   :  { %1394 = vmatpush3.bf16.msra.mxu0 %v1575_v7  ;;  %1562 = vmatpush3.bf16.msra.mxu1 %v1575_v7 }
  0x1c   :  { %1395 = vmatprep.subr.bf16.mxu0 %v1576_v8  ;;  %1555 = vmatprep.subr.bf16.mxu1 %v1576_v8 }
  0x1f   :  { %1396 = vmatpush3.bf16.msra.mxu0 %v1576_v8  ;;  %1563 = vmatpush3.bf16.msra.mxu1 %v1576_v8 }
  0x20   :  { %1518 = vmatprep.subr.bf16.mxu1 %v1609_v41 }
  0x22   :  { %1398 = vmatmul.mubr.bf16.vlgmr.msra.gmra.mrb[0].mxu0 %v1578_v9  ;;  %1442 = vmatmul.mubr.bf16.vlgmr.msra.gmra.mrb[0].mxu1 %v1600_v12 }
  0x23   :  { %1401 = vmatprep.mubr.bf16.mxu0 %v1579_v10  ;;  %1445 = vmatprep.mubr.bf16.mxu1 %v1601_v13 }
  0x24   :  { %1520 = vmatpush3.bf16.msra.mxu1 %v1519_v45 }
  0x25   :  { %1521 = vmatprep.subr.bf16.mxu1 %v1609_v41 }
  0x2a   :  { %1402 = vmatmul.mubr.bf16.gmra.mrb[4].mxu0 %v1580_v14  ;;  %1446 = vmatmul.mubr.bf16.gmra.mrb[4].mxu1 %v1602_v16 }
  0x2b   :  { %1405 = vmatprep.mubr.bf16.mxu0 %v1581_v15  ;;  %1449 = vmatprep.mubr.bf16.mxu1 %v1603_v17 }
  0x32   :  { %1406 = vmatmul.mubr.bf16.gmra.mrb[8].mxu0 %v1582_v18  ;;  %1450 = vmatmul.mubr.bf16.gmra.mrb[8].mxu1 %v1604_v19 }
  0x33   :  { %1409 = vmatprep.mubr.bf16.mxu0 %v1583_v20  ;;  %1453 = vmatprep.mubr.bf16.mxu1 %v1605_v21 }
  0x3a   :  { %1410 = vmatmul.mubr.bf16.gmra.mrb[12].mxu0 %v1584_v22  ;;  %1454 = vmatmul.mubr.bf16.gmra.mrb[12].mxu1 %v1606_v23 }
  0x3b   :  { %1413 = vmatprep.mubr.bf16.mxu0 %v1585_v24  ;;  %1457 = vmatprep.mubr.bf16.mxu1 %v1607_v25  ;;  %v836_v25 = vld [vmem:[%s2064_s2 + $0x10] sm:$0xff] }
  0x42   :  { %1414 = vmatmul.mubr.bf16.gmra.mrb[16].mxu0 %v1586_v26  ;;  %1458 = vmatmul.mubr.bf16.gmra.mrb[16].mxu1 %v1608_v27  ;;  %v837_v26 = vld [vmem:[%s2064_s2 + $0x18] sm:$0xff] }
  0x43   :  { %1417 = vmatprep.mubr.bf16.mxu0 %v1587_v28 }
  0x4a   :  { %1418 = vmatmul.mubr.bf16.gmra.mrb[20].mxu0 %v1588_v29 }
  0x4b   :  { %1421 = vmatprep.mubr.bf16.mxu0 %v1589_v30 }
  0x52   :  { %1422 = vmatmul.mubr.bf16.gmra.mrb[24].mxu0 %v1590_v31  ;;  %v1522_v31 = vpack.c.bf16 %v837_v26, %v836_v25 }
  0x53   :  { %1425 = vmatprep.mubr.bf16.mxu0 %v1591_v32 }
  0x54   :  { %1523 = vmatpush3.bf16.msra.mxu1 %v1522_v31 }
  0x55   :  { %1524 = vmatprep.subr.bf16.mxu1 %v1609_v41 }
  0x5a   :  { %1426 = vmatmul.mubr.bf16.gmra.mrb[28].mxu0 %v1592_v33 }
  0x5b   :  { %1429 = vmatprep.mubr.bf16.mxu0 %v1593_v34 }
  0x62   :  { %1430 = vmatmul.mubr.bf16.gmra.mrb[32].mxu0 %v1594_v35  ;;  %v1611_v35 = vmov 0.0  }
  0x63   :  { %1433 = vmatprep.mubr.bf16.mxu0 %v1595_v36  ;;  %1469 = vmatprep.mubr.msk.f32.mxu1 %vm1610_vm1, %v1611_v35 }
  0x6a   :  { %1434 = vmatmul.mubr.bf16.gmra.mrb[36].mxu0 %v1596_v37 }
  0x6b   :  { %1437 = vmatprep.mubr.bf16.mxu0 %v1597_v38 }
  0x72   :  { %1438 = vmatmul.mubr.bf16.gmra.mrb[40].mxu0 %v1598_v39 }
  0xf5   :  { %v1399_v49 = vpop.f32.mrb[0].mxu0  ;;  %v1773_v50 = vpop.f32.mrb[0].mxu1 }
  0xf6   :  { %v374_v51 = vpop.f32.mrb[1].mxu0  ;;  %v1775_v52 = vpop.f32.mrb[1].mxu1  ;;  %v383_v53 = vadd.f32 %v1399_v49, %v1771_v48 }
  0xf7   :  { %v375_v54 = vadd.f32 %v374_v51, %v1771_v48  ;;  %v1400_v55 = vpop.f32.mrb[2].mxu0  ;;  %v1779_v56 = vpop.f32.mrb[2].mxu1 }
  0xf8   :  { %v377_v57 = vpop.f32.mrb[3].mxu0  ;;  %v1781_v58 = vpop.f32.mrb[3].mxu1  ;;  %v386_v60 = vadd.f32 %v1400_v55, %v1771_v48  ;;  %v631_v62 = vmax.f32 %v383_v53, 0.0 }
  0xf9   :  { %v629_v59 = vmax.f32 %v375_v54, 0.0  ;;  %v378_v61 = vadd.f32 %v377_v57, %v1771_v48 }
  0xfa   :  { %v632_v1 = vmax.f32 %v386_v60, 0.0  ;;  %v697_v8 = vsel %vm693_vm0, %v631_v62, 0.0 }
  0xfb   :  { %v630_v63 = vmax.f32 %v378_v61, 0.0  ;;  %v694_v0 = vsel %vm693_vm0, %v629_v59, 0.0 }
  0xfc   :  { %v699_v16 = vsel %vm693_vm0, %v632_v1, 0.0 }
  0xfd   :  { %v695_v2 = vsel %vm693_vm0, %v630_v63, 0.0  ;;  %v1403_v3 = vpop.f32.mrb[4].mxu0  ;;  %v1787_v4 = vpop.f32.mrb[4].mxu1 }
  0xfe   :  { %v696_v5 = vadd.f32 %v695_v2, %v694_v0  ;;  %v390_v6 = vpop.f32.mrb[5].mxu0  ;;  %v1789_v7 = vpop.f32.mrb[5].mxu1  ;;  %v399_v9 = vadd.f32 %v1403_v3, %v1771_v48 }
  0xff   :  { %v391_v10 = vadd.f32 %v390_v6, %v1771_v48  ;;  %v1404_v11 = vpop.f32.mrb[6].mxu0  ;;  %v1794_v12 = vpop.f32.mrb[6].mxu1 }
 0x100   :  { %v698_v13 = vadd.f32 %v697_v8, %v696_v5  ;;  %v393_v14 = vpop.f32.mrb[7].mxu0  ;;  %v1796_v15 = vpop.f32.mrb[7].mxu1  ;;  %v402_v18 = vadd.f32 %v1404_v11, %v1771_v48  ;;  %v635_v21 = vmax.f32 %v399_v9, 0.0 }
 0x101   :  { %v633_v17 = vmax.f32 %v391_v10, 0.0  ;;  %v394_v19 = vadd.f32 %v393_v14, %v1771_v48 }
 0x102   :  { %v700_v20 = vadd.f32 %v699_v16, %v698_v13  ;;  %v636_v27 = vmax.f32 %v402_v18, 0.0  ;;  %v705_v36 = vsel %vm693_vm0, %v635_v21, 0.0 }
 0x103   :  { %v701_v22 = vsel %vm693_vm0, %v633_v17, 0.0  ;;  %v634_v23 = vmax.f32 %v394_v19, 0.0 }
 0x104   :  { %v702_v24 = vadd.f32 %v701_v22, %v700_v20  ;;  %v707_v46 = vsel %vm693_vm0, %v636_v27, 0.0 }
 0x105   :  { %v703_v28 = vsel %vm693_vm0, %v634_v23, 0.0  ;;  %v1407_v29 = vpop.f32.mrb[8].mxu0  ;;  %v1809_v30 = vpop.f32.mrb[8].mxu1 }
 0x106   :  { %v704_v32 = vadd.f32 %v703_v28, %v702_v24  ;;  %v406_v33 = vpop.f32.mrb[9].mxu0  ;;  %v1811_v34 = vpop.f32.mrb[9].mxu1  ;;  %v415_v37 = vadd.f32 %v1407_v29, %v1771_v48 }
 0x107   :  { %v407_v38 = vadd.f32 %v406_v33, %v1771_v48  ;;  %v1408_v39 = vpop.f32.mrb[10].mxu0  ;;  %v1818_v40 = vpop.f32.mrb[10].mxu1 }
 0x108   :  { %v706_v43 = vadd.f32 %v705_v36, %v704_v32  ;;  %v409_v44 = vpop.f32.mrb[11].mxu0  ;;  %v1820_v45 = vpop.f32.mrb[11].mxu1  ;;  %v418_v51 = vadd.f32 %v1408_v39, %v1771_v48  ;;  %v639_v55 = vmax.f32 %v415_v37, 0.0 }
 0x109   :  { %v637_v49 = vmax.f32 %v407_v38, 0.0  ;;  %v410_v53 = vadd.f32 %v409_v44, %v1771_v48 }
 0x10a   :  { %v708_v54 = vadd.f32 %v707_v46, %v706_v43  ;;  %v640_v61 = vmax.f32 %v418_v51, 0.0  ;;  %v713_v5 = vsel %vm693_vm0, %v639_v55, 0.0 }
 0x10b   :  { %v709_v57 = vsel %vm693_vm0, %v637_v49, 0.0  ;;  %v638_v59 = vmax.f32 %v410_v53, 0.0 }
 0x10c   :  { %v710_v60 = vadd.f32 %v709_v57, %v708_v54  ;;  %v715_v16 = vsel %vm693_vm0, %v640_v61, 0.0 }
 0x10d   :  { %v711_v62 = vsel %vm693_vm0, %v638_v59, 0.0  ;;  %v1411_v63 = vpop.f32.mrb[12].mxu0  ;;  %v1828_v0 = vpop.f32.mrb[12].mxu1 }
 0x10e   :  { %v712_v1 = vadd.f32 %v711_v62, %v710_v60  ;;  %v422_v2 = vpop.f32.mrb[13].mxu0  ;;  %v1830_v3 = vpop.f32.mrb[13].mxu1  ;;  %v431_v6 = vadd.f32 %v1411_v63, %v1771_v48 }
 0x10f   :  { %v423_v8 = vadd.f32 %v422_v2, %v1771_v48  ;;  %v1412_v9 = vpop.f32.mrb[14].mxu0  ;;  %v1835_v10 = vpop.f32.mrb[14].mxu1 }
 0x110   :  { %v714_v11 = vadd.f32 %v713_v5, %v712_v1  ;;  %v425_v13 = vpop.f32.mrb[15].mxu0  ;;  %v1837_v14 = vpop.f32.mrb[15].mxu1  ;;  %v434_v18 = vadd.f32 %v1412_v9, %v1771_v48  ;;  %v643_v21 = vmax.f32 %v431_v6, 0.0 }
 0x111   :  { %v641_v17 = vmax.f32 %v423_v8, 0.0  ;;  %v426_v19 = vadd.f32 %v425_v13, %v1771_v48 }
 0x112   :  { %v716_v20 = vadd.f32 %v715_v16, %v714_v11  ;;  %v644_v25 = vmax.f32 %v434_v18, 0.0  ;;  %v721_v33 = vsel %vm693_vm0, %v643_v21, 0.0 }
 0x113   :  { %v717_v22 = vsel %vm693_vm0, %v641_v17, 0.0  ;;  %v642_v23 = vmax.f32 %v426_v19, 0.0 }
 0x114   :  { %v718_v24 = vadd.f32 %v717_v22, %v716_v20  ;;  %v723_v49 = vsel %vm693_vm0, %v644_v25, 0.0 }
 0x115   :  { %v719_v26 = vsel %vm693_vm0, %v642_v23, 0.0  ;;  %v1415_v27 = vpop.f32.mrb[16].mxu0  ;;  %v1844_v28 = vpop.f32.mrb[16].mxu1 }
 0x116   :  { %v720_v29 = vadd.f32 %v719_v26, %v718_v24  ;;  %v438_v31 = vpop.f32.mrb[17].mxu0  ;;  %v1846_v32 = vpop.f32.mrb[17].mxu1  ;;  %v447_v36 = vadd.f32 %v1415_v27, %v1771_v48 }
 0x117   :  { %v439_v37 = vadd.f32 %v438_v31, %v1771_v48  ;;  %v1416_v38 = vpop.f32.mrb[18].mxu0  ;;  %v1851_v39 = vpop.f32.mrb[18].mxu1 }
 0x118   :  { %v722_v43 = vadd.f32 %v721_v33, %v720_v29  ;;  %v441_v44 = vpop.f32.mrb[19].mxu0  ;;  %v1853_v46 = vpop.f32.mrb[19].mxu1  ;;  %v450_v53 = vadd.f32 %v1416_v38, %v1771_v48  ;;  %v647_v57 = vmax.f32 %v447_v36, 0.0 }
 0x119   :  { %v645_v51 = vmax.f32 %v439_v37, 0.0  ;;  %v442_v54 = vadd.f32 %v441_v44, %v1771_v48 }
 0x11a   :  { %v724_v55 = vadd.f32 %v723_v49, %v722_v43  ;;  %v648_v62 = vmax.f32 %v450_v53, 0.0  ;;  %v729_v6 = vsel %vm693_vm0, %v647_v57, 0.0 }
 0x11b   :  { %v725_v59 = vsel %vm693_vm0, %v645_v51, 0.0  ;;  %v646_v60 = vmax.f32 %v442_v54, 0.0 }
 0x11c   :  { %v726_v61 = vadd.f32 %v725_v59, %v724_v55  ;;  %v731_v17 = vsel %vm693_vm0, %v648_v62, 0.0 }
 0x11d   :  { %v727_v63 = vsel %vm693_vm0, %v646_v60, 0.0  ;;  %v1419_v1 = vpop.f32.mrb[20].mxu0 }
 0x11e   :  { %v728_v2 = vadd.f32 %v727_v63, %v726_v61  ;;  %v454_v5 = vpop.f32.mrb[21].mxu0  ;;  %v463_v8 = vadd.f32 %v1419_v1, %v1771_v48 }
 0x11f   :  { %v455_v9 = vadd.f32 %v454_v5, %v1771_v48  ;;  %v1420_v11 = vpop.f32.mrb[22].mxu0 }
 0x120   :  { %v730_v13 = vadd.f32 %v729_v6, %v728_v2  ;;  %v457_v16 = vpop.f32.mrb[23].mxu0  ;;  %v466_v19 = vadd.f32 %v1420_v11, %v1771_v48  ;;  %v651_v22 = vmax.f32 %v463_v8, 0.0 }
 0x121   :  { %v649_v18 = vmax.f32 %v455_v9, 0.0  ;;  %v458_v20 = vadd.f32 %v457_v16, %v1771_v48 }
 0x122   :  { %v732_v21 = vadd.f32 %v731_v17, %v730_v13  ;;  %v652_v26 = vmax.f32 %v466_v19, 0.0  ;;  %v737_v36 = vsel %vm693_vm0, %v651_v22, 0.0 }
 0x123   :  { %v733_v23 = vsel %vm693_vm0, %v649_v18, 0.0  ;;  %v650_v24 = vmax.f32 %v458_v20, 0.0 }
 0x124   :  { %v734_v25 = vadd.f32 %v733_v23, %v732_v21  ;;  %v739_v51 = vsel %vm693_vm0, %v652_v26, 0.0 }
 0x125   :  { %v735_v27 = vsel %vm693_vm0, %v650_v24, 0.0  ;;  %v1423_v29 = vpop.f32.mrb[24].mxu0 }
 0x126   :  { %v736_v31 = vadd.f32 %v735_v27, %v734_v25  ;;  %v470_v33 = vpop.f32.mrb[25].mxu0  ;;  %v479_v37 = vadd.f32 %v1423_v29, %v1771_v48 }
 0x127   :  { %v471_v38 = vadd.f32 %v470_v33, %v1771_v48  ;;  %v1424_v43 = vpop.f32.mrb[26].mxu0 }
 0x128   :  { %v738_v44 = vadd.f32 %v737_v36, %v736_v31  ;;  %v473_v49 = vpop.f32.mrb[27].mxu0  ;;  %v482_v54 = vadd.f32 %v1424_v43, %v1771_v48  ;;  %v655_v59 = vmax.f32 %v479_v37, 0.0 }
 0x129   :  { %v653_v53 = vmax.f32 %v471_v38, 0.0  ;;  %v474_v55 = vadd.f32 %v473_v49, %v1771_v48 }
 0x12a   :  { %v740_v57 = vadd.f32 %v739_v51, %v738_v44  ;;  %v656_v63 = vmax.f32 %v482_v54, 0.0  ;;  %v745_v8 = vsel %vm693_vm0, %v655_v59, 0.0 }
 0x12b   :  { %v741_v60 = vsel %vm693_vm0, %v653_v53, 0.0  ;;  %v654_v61 = vmax.f32 %v474_v55, 0.0 }
 0x12c   :  { %v742_v62 = vadd.f32 %v741_v60, %v740_v57  ;;  %v747_v18 = vsel %vm693_vm0, %v656_v63, 0.0 }
 0x12d   :  { %v743_v1 = vsel %vm693_vm0, %v654_v61, 0.0  ;;  %v1427_v2 = vpop.f32.mrb[28].mxu0 }
 0x12e   :  { %v744_v5 = vadd.f32 %v743_v1, %v742_v62  ;;  %v486_v6 = vpop.f32.mrb[29].mxu0  ;;  %v495_v9 = vadd.f32 %v1427_v2, %v1771_v48 }
 0x12f   :  { %v487_v11 = vadd.f32 %v486_v6, %v1771_v48  ;;  %v1428_v13 = vpop.f32.mrb[30].mxu0 }
 0x130   :  { %v746_v16 = vadd.f32 %v745_v8, %v744_v5  ;;  %v489_v17 = vpop.f32.mrb[31].mxu0  ;;  %v498_v20 = vadd.f32 %v1428_v13, %v1771_v48  ;;  %v659_v23 = vmax.f32 %v495_v9, 0.0 }
 0x131   :  { %v657_v19 = vmax.f32 %v487_v11, 0.0  ;;  %v490_v21 = vadd.f32 %v489_v17, %v1771_v48 }
 0x132   :  { %v748_v22 = vadd.f32 %v747_v18, %v746_v16  ;;  %v660_v27 = vmax.f32 %v498_v20, 0.0  ;;  %v753_v37 = vsel %vm693_vm0, %v659_v23, 0.0 }
 0x133   :  { %v749_v24 = vsel %vm693_vm0, %v657_v19, 0.0  ;;  %v658_v25 = vmax.f32 %v490_v21, 0.0 }
 0x134   :  { %v750_v26 = vadd.f32 %v749_v24, %v748_v22  ;;  %v755_v53 = vsel %vm693_vm0, %v660_v27, 0.0 }
 0x135   :  { %v751_v29 = vsel %vm693_vm0, %v658_v25, 0.0  ;;  %v1431_v31 = vpop.f32.mrb[32].mxu0 }
 0x136   :  { %v752_v33 = vadd.f32 %v751_v29, %v750_v26  ;;  %v502_v36 = vpop.f32.mrb[33].mxu0  ;;  %v511_v38 = vadd.f32 %v1431_v31, %v1771_v48 }
 0x137   :  { %v503_v43 = vadd.f32 %v502_v36, %v1771_v48  ;;  %v1432_v44 = vpop.f32.mrb[34].mxu0 }
 0x138   :  { %v754_v49 = vadd.f32 %v753_v37, %v752_v33  ;;  %v505_v51 = vpop.f32.mrb[35].mxu0  ;;  %v514_v55 = vadd.f32 %v1432_v44, %v1771_v48  ;;  %v663_v60 = vmax.f32 %v511_v38, 0.0 }
 0x139   :  { %v661_v54 = vmax.f32 %v503_v43, 0.0  ;;  %v506_v57 = vadd.f32 %v505_v51, %v1771_v48 }
 0x13a   :  { %v1890_v59 = vadd.f32 %v755_v53, %v754_v49  ;;  %v664_v63 = vmax.f32 %v514_v55, 0.0  ;;  %v766_v8 = vsel %vm693_vm0, %v663_v60, 0.0  ;;  %v551_v53 = vadd.f32 %v1775_v52, %v1771_v48 }
 0x13b   :  { %v662_v61 = vmax.f32 %v506_v57, 0.0  ;;  %v763_v62 = vsel %vm693_vm0, %v661_v54, 0.0  ;;  %v554_v52 = vadd.f32 %v1781_v58, %v1771_v48 }
 0x13c   :  { %v768_v18 = vsel %vm693_vm0, %v664_v63, 0.0 }
 0x13d   :  { %v764_v1 = vsel %vm693_vm0, %v662_v61, 0.0  ;;  %v1435_v2 = vpop.f32.mrb[36].mxu0 }
 0x13e   :  { %v765_v5 = vadd.f32 %v764_v1, %v763_v62  ;;  %v518_v6 = vpop.f32.mrb[37].mxu0  ;;  %v527_v9 = vadd.f32 %v1435_v2, %v1771_v48 }
 0x13f   :  { %v519_v11 = vadd.f32 %v518_v6, %v1771_v48  ;;  %v1436_v13 = vpop.f32.mrb[38].mxu0 }
 0x140   :  { %v767_v16 = vadd.f32 %v766_v8, %v765_v5  ;;  %v521_v17 = vpop.f32.mrb[39].mxu0  ;;  %v530_v20 = vadd.f32 %v1436_v13, %v1771_v48  ;;  %v667_v23 = vmax.f32 %v527_v9, 0.0  ;;  %v673_v8 = vmax.f32 %v551_v53, 0.0 }
 0x141   :  { %v665_v19 = vmax.f32 %v519_v11, 0.0  ;;  %v522_v21 = vadd.f32 %v521_v17, %v1771_v48  ;;  %v559_v13 = vadd.f32 %v1773_v50, %v1771_v48  ;;  %v562_v17 = vadd.f32 %v1779_v56, %v1771_v48 }
 0x142   :  { %v769_v22 = vadd.f32 %v768_v18, %v767_v16  ;;  %v668_v27 = vmax.f32 %v530_v20, 0.0  ;;  %v774_v37 = vsel %vm693_vm0, %v667_v23, 0.0  ;;  %v674_v20 = vmax.f32 %v554_v52, 0.0 }
 0x143   :  { %v770_v24 = vsel %vm693_vm0, %v665_v19, 0.0  ;;  %v666_v25 = vmax.f32 %v522_v21, 0.0  ;;  %v786_v19 = vsel %vm693_vm0, %v673_v8, 0.0  ;;  %v567_v21 = vadd.f32 %v1789_v7, %v1771_v48 }
 0x144   :  { %v771_v26 = vadd.f32 %v770_v24, %v769_v22  ;;  %v776_v54 = vsel %vm693_vm0, %v668_v27, 0.0  ;;  %v675_v58 = vmax.f32 %v559_v13, 0.0  ;;  %v676_v24 = vmax.f32 %v562_v17, 0.0 }
 0x145   :  { %v772_v29 = vsel %vm693_vm0, %v666_v25, 0.0  ;;  %v1439_v31 = vpop.f32.mrb[40].mxu0  ;;  %v788_v25 = vsel %vm693_vm0, %v674_v20, 0.0  ;;  %v570_v50 = vadd.f32 %v1796_v15, %v1771_v48 }
 0x146   :  { %v773_v33 = vadd.f32 %v772_v29, %v771_v26  ;;  %v534_v36 = vpop.f32.mrb[41].mxu0  ;;  %v543_v38 = vadd.f32 %v1439_v31, %v1771_v48  ;;  %v677_v26 = vmax.f32 %v567_v21, 0.0  ;;  %v790_v56 = vsel %vm693_vm0, %v675_v58, 0.0 }
 0x147   :  { %v535_v43 = vadd.f32 %v534_v36, %v1771_v48  ;;  %v1440_v44 = vpop.f32.mrb[42].mxu0  ;;  %v575_v29 = vadd.f32 %v1787_v4, %v1771_v48  ;;  %v792_v31 = vsel %vm693_vm0, %v676_v24, 0.0  ;;  %v578_v36 = vadd.f32 %v1794_v12, %v1771_v48 }
 0x148   :  { %v775_v49 = vadd.f32 %v774_v37, %v773_v33  ;;  %v537_v51 = vpop.f32.mrb[43].mxu0  ;;  %v546_v57 = vadd.f32 %v1440_v44, %v1771_v48  ;;  %v671_v62 = vmax.f32 %v543_v38, 0.0  ;;  %v794_v7 = vsel %vm693_vm0, %v677_v26, 0.0 }
 0x149   :  { %v669_v55 = vmax.f32 %v535_v43, 0.0  ;;  %v538_v60 = vadd.f32 %v537_v51, %v1771_v48  ;;  %v678_v37 = vmax.f32 %v570_v50, 0.0  ;;  %v583_v38 = vadd.f32 %v1811_v34, %v1771_v48 }
 0x14a   :  { %v777_v61 = vadd.f32 %v776_v54, %v775_v49  ;;  %v672_v5 = vmax.f32 %v546_v57, 0.0  ;;  %v782_v11 = vsel %vm693_vm0, %v671_v62, 0.0  ;;  %v679_v15 = vmax.f32 %v575_v29, 0.0 }
 0x14b   :  { %v778_v63 = vsel %vm693_vm0, %v669_v55, 0.0  ;;  %v670_v1 = vmax.f32 %v538_v60, 0.0  ;;  %v680_v49 = vmax.f32 %v578_v36, 0.0  ;;  %v796_v51 = vsel %vm693_vm0, %v678_v37, 0.0 }
 0x14c   :  { %v779_v2 = vadd.f32 %v778_v63, %v777_v61  ;;  %v784_v18 = vsel %vm693_vm0, %v672_v5, 0.0  ;;  %v681_v53 = vmax.f32 %v583_v38, 0.0  ;;  %v586_v4 = vadd.f32 %v1820_v45, %v1771_v48 }
 0x14d   :  { %v780_v6 = vsel %vm693_vm0, %v670_v1, 0.0  ;;  %v798_v55 = vsel %vm693_vm0, %v679_v15, 0.0  ;;  %v591_v12 = vadd.f32 %v1809_v30, %v1771_v48  ;;  %v594_v34 = vadd.f32 %v1818_v40, %v1771_v48 }
 0x14e   :  { %v781_v9 = vadd.f32 %v780_v6, %v779_v2  ;;  %v800_v60 = vsel %vm693_vm0, %v680_v49, 0.0  ;;  %v802_v61 = vsel %vm693_vm0, %v681_v53, 0.0  ;;  %v682_v62 = vmax.f32 %v586_v4, 0.0 }
 0x14f   :  { %v599_v63 = vadd.f32 %v1830_v3, %v1771_v48  ;;  %v683_v45 = vmax.f32 %v591_v12, 0.0  ;;  %v684_v5 = vmax.f32 %v594_v34, 0.0  ;;  %v602_v30 = vadd.f32 %v1837_v14, %v1771_v48  ;;  %v839_v12 = vld [vmem:[%s2064_s2 + $0x28] sm:$0xff] }
 0x150   :  { %v783_v16 = vadd.f32 %v782_v11, %v781_v9  ;;  %v804_v6 = vsel %vm693_vm0, %v682_v62, 0.0  ;;  %v607_v9 = vadd.f32 %v1828_v0, %v1771_v48  ;;  %v618_v0 = vadd.f32 %v1853_v46, %v1771_v48 }
 0x151   :  { %v685_v8 = vmax.f32 %v599_v63, 0.0  ;;  %v806_v40 = vsel %vm693_vm0, %v683_v45, 0.0  ;;  %v808_v11 = vsel %vm693_vm0, %v684_v5, 0.0  ;;  %v686_v17 = vmax.f32 %v602_v30, 0.0  ;;  %v840_v63 = vld [vmem:[%s2064_s2 + $0x30] sm:$0xff] }
 0x152   :  { %v785_v22 = vadd.f32 %v784_v18, %v783_v16  ;;  %v610_v16 = vadd.f32 %v1835_v10, %v1771_v48  ;;  %v615_v18 = vadd.f32 %v1846_v32, %v1771_v48  ;;  %v687_v14 = vmax.f32 %v607_v9, 0.0 }
 0x153   :  { %v810_v3 = vsel %vm693_vm0, %v685_v8, 0.0  ;;  %v623_v10 = vadd.f32 %v1844_v28, %v1771_v48  ;;  %v938_v9 = vsub.s32 2, %v1755_v42 }
 0x154   :  { %v787_v23 = vadd.f32 %v786_v19, %v785_v22  ;;  %v688_v21 = vmax.f32 %v610_v16, 0.0  ;;  %v812_v22 = vsel %vm693_vm0, %v686_v17, 0.0  ;;  %v689_v58 = vmax.f32 %v615_v18, 0.0 }
 0x155   :  { %v814_v24 = vsel %vm693_vm0, %v687_v14, 0.0  ;;  %v845_v14 = vld [vmem:[%s2064_s2 + $0x58] sm:$0xff] }
 0x156   :  { %v789_v27 = vadd.f32 %v788_v25, %v787_v23  ;;  %v757_v25 = vrot.slane %v1890_v59, 4  ;;  %v816_v32 = vsel %vm693_vm0, %v688_v21, 0.0  ;;  %v818_v50 = vsel %vm693_vm0, %v689_v58, 0.0  ;;  %v848_v58 = vld [vmem:[%s2064_s2 + $0x70] sm:$0xff] }
 0x158   :  { %v791_v33 = vadd.f32 %v790_v56, %v789_v27  ;;  %v626_v27 = vadd.f32 %v1851_v39, %v1771_v48  ;;  %v690_v56 = vmax.f32 %v618_v0, 0.0  ;;  %v758_v46 = vadd.f32 %v757_v25, %v1890_v59 }
 0x159   :  { %v1015_v25 = vsub.s32 3, %v1755_v42 }
 0x15a   :  { %v793_v43 = vadd.f32 %v792_v31, %v791_v33  ;;  %v691_v31 = vmax.f32 %v623_v10, 0.0  ;;  %v820_v36 = vsel %vm693_vm0, %v690_v56, 0.0  ;;  %v759_v38 = vrot.slane %v758_v46, 2 }
 0x15c   :  { %v795_v44 = vadd.f32 %v794_v7, %v793_v43  ;;  %v692_v7 = vmax.f32 %v626_v27, 0.0  ;;  %v822_v37 = vsel %vm693_vm0, %v691_v31, 0.0  ;;  %v760_v49 = vadd.f32 %v759_v38, %v758_v46  ;;  %v852_v27 = vld [vmem:[%s2064_s2 + $0x90] sm:$0xff] }
 0x15e   :  { %v797_v54 = vadd.f32 %v796_v51, %v795_v44  ;;  %v824_v15 = vsel %vm693_vm0, %v692_v7, 0.0  ;;  %v761_v39 = vrot.slane %v760_v49, 1  ;;  %v853_v7 = vld [vmem:[%s2064_s2 + $0x98] sm:$0xff] }
 0x160   :  { %v799_v57 = vadd.f32 %v798_v55, %v797_v54  ;;  %v762_v59 = vadd.f32 %v761_v39, %v760_v49  ;;  %v838_v55 = vld [vmem:[%s2064_s2 + $0x20] sm:$0xff]  ;;  %v1177_v49 = vsub.s32 5, %v1755_v42 }
 0x162   :  { %v801_v1 = vadd.f32 %v800_v60, %v799_v57  ;;  %v832_v34 = vmul.f32 0.00390625, %v762_v59 }
 0x164   :  { %v803_v2 = vadd.f32 %v802_v61, %v801_v1  ;;  %v1525_v61 = vpack.c.bf16 %v839_v12, %v838_v55  ;;  %v841_v1 = vld [vmem:[%s2064_s2 + $0x38] sm:$0xff] }
 0x165   :  { %v1528_v45 = vpack.c.bf16 %v841_v1, %v840_v63 }
 0x166   :  { %v805_v52 = vadd.f32 %v804_v6, %v803_v2  ;;  %v857_v2 = vsub.s32 1, %v1755_v42 }
 0x168   :  { %v807_v13 = vadd.f32 %v806_v40, %v805_v52  ;;  %v858_v5 = vrot.slane %v1767_v47, %v857_v2  ;;  %v842_v40 = vld [vmem:[%s2064_s2 + $0x40] sm:$0xff] }
 0x16a   :  { %v809_v19 = vadd.f32 %v808_v11, %v807_v13  ;;  %v939_v11 = vrot.slane %v1767_v47, %v938_v9  ;;  %v843_v13 = vld [vmem:[%s2064_s2 + $0x48] sm:$0xff] }
 0x16c   :  { %v811_v20 = vadd.f32 %v810_v3, %v809_v19  ;;  %v844_v3 = vld [vmem:[%s2064_s2 + $0x50] sm:$0xff] }
 0x16d   :  { %v1531_v17 = vpack.c.bf16 %v844_v3, %v843_v13 }
 0x16e   :  { %v813_v23 = vadd.f32 %v812_v22, %v811_v20  ;;  %v846_v20 = vld [vmem:[%s2064_s2 + $0x60] sm:$0xff]  ;;  %v847_v22 = vld [vmem:[%s2064_s2 + $0x68] sm:$0xff] }
 0x16f   :  { %v1534_v21 = vpack.c.bf16 %v846_v20, %v845_v14  ;;  %v1537_v0 = vpack.c.bf16 %v848_v58, %v847_v22 }
 0x170   :  { %v815_v26 = vadd.f32 %v814_v24, %v813_v23  ;;  %v849_v23 = vld [vmem:[%s2064_s2 + $0x78] sm:$0xff]  ;;  %v850_v24 = vld [vmem:[%s2064_s2 + $0x80] sm:$0xff] }
 0x171   :  { %v1540_v10 = vpack.c.bf16 %v850_v24, %v849_v23 }
 0x172   :  { %v817_v29 = vadd.f32 %v816_v32, %v815_v26  ;;  %v1016_v26 = vrot.slane %v1767_v47, %v1015_v25 }
 0x174   :  { %v819_v33 = vadd.f32 %v818_v50, %v817_v29  ;;  %v851_v50 = vld [vmem:[%s2064_s2 + $0x88] sm:$0xff] }
 0x175   :  { %v1543_v46 = vpack.c.bf16 %v852_v27, %v851_v50 }
 0x176   :  { %v821_v28 = vadd.f32 %v820_v36, %v819_v33  ;;  %v854_v36 = vld [vmem:[%s2064_s2 + $0xa0] sm:$0xff]  ;;  %s1613_s2 = smov 40  }
 0x178   :  { %v823_v43 = vadd.f32 %v822_v37, %v821_v28  ;;  %v1546_v28 = vpack.c.bf16 %v854_v36, %v853_v7  ;;  %v1096_v37 = vsub.s32 4, %v1755_v42 }
 0x17a   :  { %v825_v44 = vadd.f32 %v824_v15, %v823_v43  ;;  %v1097_v38 = vrot.slane %v1767_v47, %v1096_v37 }
 0x17c   :  { %v826_v51 = vrot.slane %v825_v44, 4 }
 0x17e   :  { %v827_v48 = vadd.f32 %v826_v51, %v825_v44  ;;  %v1178_v51 = vrot.slane %v1767_v47, %v1177_v49 }
 0x180   :  { %v828_v53 = vrot.slane %v827_v48, 2 }
 0x182   :  { %v829_v4 = vadd.f32 %v828_v53, %v827_v48 }
 0x184   :  { %v830_v54 = vrot.slane %v829_v4, 1 }
 0x186   :  { %v831_v57 = vadd.f32 %v830_v54, %v829_v4 }
 0x188   :  { %v833_v60 = vmul.f32 0.00390625, %v831_v57 }
 0x18a   :  { %v1980_v62 = vsel %vm861_vm2, %v833_v60, %v832_v34 }
 0x18b   :  { %1470 = vmatmul.mubr.msk.f32.vlgmr.msra.gmra.mrb[20].mxu1 %vm693_vm0, %v1980_v62 }
 0x18c   :  { %1526 = vmatpush3.bf16.msra.mxu1 %v1525_v61  ;;  %1480 = vmatprep.mubr.msk.f32.mxu1 %vm1610_vm1, %v1611_v35 }
 0x18d   :  { %1527 = vmatprep.subr.bf16.mxu1 %v1609_v41 }
 0x190   :  { %1529 = vmatpush3.bf16.msra.mxu1 %v1528_v45 }
 0x191   :  { %1483 = vmatprep.subr.mxu1 %v1611_v35 }
 0x25e   :  { %v931_v6 = vpop.f32.mrb[20].mxu1 }
 0x25f   :  { %v932_v8 = vadd.f32 %v931_v6, %v858_v5  ;;  %v1471_v30 = vpop.f32.mrb[21].mxu1 }
 0x261   :  { %v935_v52 = vmax.f32 %v932_v8, 0.0 }
 0x263   :  { %1481 = vmatmul.mubr.msk.f32.vlgmr.msra.gmra.mrb[22].mxu1 %vm693_vm0, %v935_v52 }
 0x264   :  { %1484 = vmatpush3.msra.mxu1 %v842_v40  ;;  %1485 = vmatprep.mubr.msk.f32.mxu1 %vm1610_vm1, %v1611_v35 }
 0x265   :  { %1530 = vmatprep.subr.bf16.mxu1 %v1609_v41 }
 0x336   :  { %v1009_v16 = vpop.f32.mrb[22].mxu1 }
 0x337   :  { %v1010_v18 = vadd.f32 %v1009_v16, %v939_v11  ;;  %v1482_v19 = vpop.f32.mrb[23].mxu1 }
 0x339   :  { %1253 = vrot.lane.b32.xlu0 %v1010_v18, %s1612_s8  ;;  %1486 = vmatmul.mubr.msk.f32.vlgmr.msra.gmra.mrb[24].mxu1 %vm1017_vm3, %v1010_v18 }
 0x33a   :  { %1532 = vmatpush3.bf16.msra.mxu1 %v1531_v17  ;;  %1504 = vmatprep.mubr.msk.f32.mxu1 %vm1610_vm1, %v1611_v35 }
 0x33b   :  { %1533 = vmatprep.subr.bf16.mxu1 %v1609_v41 }
 0x33e   :  { %1535 = vmatpush3.bf16.msra.mxu1 %v1534_v21 }
 0x33f   :  { %1536 = vmatprep.subr.bf16.mxu1 %v1609_v41 }
 0x342   :  { %1538 = vmatpush3.bf16.msra.mxu1 %v1537_v0 }
 0x343   :  { %1539 = vmatprep.subr.bf16.mxu1 %v1609_v41 }
 0x346   :  { %1541 = vmatpush3.bf16.msra.mxu1 %v1540_v10 }
 0x347   :  { %1542 = vmatprep.subr.bf16.mxu1 %v1609_v41 }
 0x3ab   :  { %v1254_v4 = vpop.permute.xlu0 %1253 }
 0x3ac   :  { %v1260_v54 = vsel %vm693_vm0, %v1980_v62, %v1254_v4 }
 0x40c   :  { %v1087_v32 = vpop.f32.mrb[24].mxu1 }
 0x40d   :  { %v1088_v56 = vadd.f32 %v1087_v32, %v1016_v26  ;;  %v1487_v29 = vpop.f32.mrb[25].mxu1 }
 0x40f   :  { %vm1091_vm4 = vcmp.gt.f32.partialorder %v1088_v56, 0.0  ;;  %v1092_v31 = vmul.f32 0.1, %v1088_v56 }
 0x411   :  { %v1093_v33 = vsel %vm1091_vm4, %v1088_v56, %v1092_v31 }
 0x412   :  { %1505 = vmatmul.mubr.msk.f32.vlgmr.msra.gmra.mrb[26].mxu1 %vm1098_vm5, %v1093_v33 }
 0x413   :  { %1544 = vmatpush3.bf16.msra.mxu1 %v1543_v46  ;;  %1515 = vmatprep.mubr.msk.f32.mxu1 %vm1610_vm1, %v1611_v35 }
 0x414   :  { %1545 = vmatprep.subr.bf16.mxu1 %v1609_v41 }
 0x417   :  { %1547 = vmatpush3.bf16.msra.mxu1 %v1546_v28 }
 0x4e5   :  { %v1168_v43 = vpop.f32.mrb[26].mxu1 }
 0x4e6   :  { %v1169_v15 = vadd.f32 %v1168_v43, %v1097_v38  ;;  %v1506_v44 = vpop.f32.mrb[27].mxu1 }
 0x4e8   :  { %vm1172_vm6 = vcmp.gt.f32.partialorder %v1169_v15, 0.0  ;;  %v1173_v35 = vmul.f32 0.1, %v1169_v15 }
 0x4ea   :  { %v1174_v41 = vsel %vm1172_vm6, %v1169_v15, %v1173_v35 }
 0x4eb   :  { %1516 = vmatmul.mubr.msk.f32.vlgmr.msra.gmra.mrb[28].mxu1 %vm693_vm0, %v1174_v41 }
 0x5be   :  { %v1248_v48 = vpop.f32.mrb[28].mxu1 }
 0x5bf   :  { %v1249_v39 = vadd.f32 %v1248_v48, %v1178_v51  ;;  %v1517_v53 = vpop.f32.mrb[29].mxu1 }
 0x5c1   :  { %1257 = vrot.lane.b32.xlu0 %v1249_v39, %s1613_s2 }
 0x633   :  { %v1258_v59 = vpop.permute.xlu0 %1257 }
 0x634   :  { %v1262_v55 = vsel %vm1261_vm7, %v1260_v54, %v1258_v59 }
 0x635   :  { %v1264_v12 = vsel %vm1263_vm8, %v1262_v55, 0.0 }
 0x636   :  { %1265 = vst [vmem:[%s2065_s3] sm:$0x3] %v1264_v12 }

</bundles_post_ra>
